<compile_context>
chip_gen: v7x
topology: tpu7x:2x2x1
jax: 0.10.0
libtpu: 0.0.40
codegen_flags: <defaults>
</compile_context>

<pallas_src>
import functools
import math

import jax
import jax.numpy as jnp
from jax.experimental import pallas as pl
from jax.experimental.pallas import tpu as pltpu


# ----------------------------------------------------------------------------
# Buffer construction (deterministic, matches nn.Module.__init__)
# ----------------------------------------------------------------------------
def make_pe_table(d_model: int, max_len: int = 20000) -> jnp.ndarray:
    """Sinusoidal positional-encoding table pe[max_len, d_model] (float32)."""
    position = jnp.arange(max_len, dtype=jnp.float32)[:, None]              # (L, 1)
    div_term = jnp.exp(
        jnp.arange(0, d_model, 2, dtype=jnp.float32)
        * (-math.log(10000.0) / d_model)
    )                                                                        # (D/2,)
    ang = position * div_term                                                # (L, D/2)
    pe = jnp.zeros((max_len, d_model), dtype=jnp.float32)
    pe = pe.at[:, 0::2].set(jnp.sin(ang))
    pe = pe.at[:, 1::2].set(jnp.cos(ang))
    return pe


# ----------------------------------------------------------------------------
# Kernel: out = dropout(x + pe) over a lane-dense (seq_tile, B*D) block
# ----------------------------------------------------------------------------
def _pe_kernel(seed_ref, x_ref, pe_ref, o_ref, *,
               p: float, training: bool, batch: int, seq_tile: int, n_cols: int):
    # pe tile: (seq_tile, D) -> broadcast over batch along the lane axis so it
    # lines up with x flattened as [S, B*D] (column index = b*D + d).
    pe_tile = pe_ref[...]
    pe_b = jnp.tile(pe_tile, (1, batch)) if batch > 1 else pe_tile

    val = x_ref[...] + pe_b

    if training and p > 0.0:
        if p >= 1.0:
            val = jnp.zeros_like(val)
        else:
            # Stateless counter-based hash PRNG (splitmix32-style), uint32 math.
            rows = jax.lax.broadcasted_iota(jnp.int32, val.shape, 0).astype(jnp.uint32)
            cols = jax.lax.broadcasted_iota(jnp.int32, val.shape, 1).astype(jnp.uint32)
            row0 = (pl.program_id(0) * seq_tile).astype(jnp.uint32)
            idx = (rows + row0) * jnp.uint32(n_cols) + cols
            h = idx ^ (seed_ref[0].astype(jnp.uint32) * jnp.uint32(0x9E3779B9))
            h = (h ^ (h >> 16)) * jnp.uint32(0x7FEB352D)
            h = (h ^ (h >> 15)) * jnp.uint32(0x846CA68B)
            h = h ^ (h >> 16)
            # Integer threshold compare: P(drop) = thresh / 2^32 ~= p.
            thresh = jnp.uint32(min(0xFFFFFFFF, int(round(p * 4294967296.0))))
            keep = h >= thresh
            val = jnp.where(keep, val * (1.0 / (1.0 - p)), jnp.zeros_like(val))

    o_ref[...] = val.astype(o_ref.dtype)


# ----------------------------------------------------------------------------
# Wrapper
# ----------------------------------------------------------------------------
def positional_encoding_forward(
    x: jnp.ndarray,
    pe_table: jnp.ndarray,
    *,
    p: float = 0.1,
    training: bool = False,
    seed: int = 0,
) -> jnp.ndarray:
    """x: [seq_len, batch, d_model]; pe_table: [max_len, d_model]."""
    S, B, D = x.shape
    dtype = x.dtype
    itemsize = jnp.dtype(dtype).itemsize

    pe = pe_table[:S].astype(dtype)          # (S, D) -- static slice, plain JAX glue
    x2 = x.reshape(S, B * D)                 # free reshape: merge trailing dims

    # --- auto-size the seq tile: ~2 MiB per x/out block (HBM-roofline territory),
    #     multiple of 8 rows, never larger than S.
    row_bytes = B * D * itemsize
    target_block_bytes = 2 * 1024 * 1024
    max_rows = max(8, target_block_bytes // row_bytes)
    if max_rows >= S:
        seq_tile = S                         # single block covers the whole array
    else:
        seq_tile = max(8, (max_rows // 8) * 8)
    grid = (pl.cdiv(S, seq_tile),)           # ragged last block: OOB writes dropped

    seed_arr = jnp.array([seed], dtype=jnp.int32)
    kernel = functools.partial(
        _pe_kernel, p=float(p), training=bool(training),
        batch=B, seq_tile=seq_tile, n_cols=B * D,
    )

    cost = pl.CostEstimate(
        flops=S * B * D,
        transcendentals=0,
        bytes_accessed=2 * S * B * D * itemsize + S * D * itemsize,
    )

    out2 = pl.pallas_call(
        kernel,
        out_shape=jax.ShapeDtypeStruct((S, B * D), dtype),
        grid_spec=pltpu.PrefetchScalarGridSpec(
            num_scalar_prefetch=1,           # seed lands in SMEM
            grid=grid,
            in_specs=[
                # x slab tile: sublane = seq rows (dense), lane = B*D (full extent)
                pl.BlockSpec((seq_tile, B * D), lambda i, s_ref: (i, 0)),
                # pe tile: (seq_tile, D)
                pl.BlockSpec((seq_tile, D), lambda i, s_ref: (i, 0)),
            ],
            out_specs=pl.BlockSpec((seq_tile, B * D), lambda i, s_ref: (i, 0)),
        ),
        compiler_params=pltpu.CompilerParams(
            dimension_semantics=("parallel",),        # grid steps fully independent
            vmem_limit_bytes=32 * 1024 * 1024,        # safe on v5e / v6e / v7x
        ),
        cost_estimate=cost,
        # Callers that can donate x may additionally pass
        # input_output_aliases={1: 0} to avoid a second S*B*D HBM buffer.
    )(seed_arr, x2, pe)

    return out2.reshape(S, B, D)


# ----------------------------------------------------------------------------
# Demo / smoke test
# ----------------------------------------------------------------------------
if __name__ == "__main__":
    d_model = 32
    seq_len = 8
    batch = 2
    max_len = 64   # module default is 20000; a small table suffices for the demo

    pe_table = make_pe_table(d_model, max_len)

    key = jax.random.PRNGKey(0)
    x = jax.random.normal(key, (seq_len, batch, d_model), dtype=jnp.float32)

    # Eval mode (dropout is identity): check against plain-JAX reference.
    out_eval = positional_encoding_forward(x, pe_table, p=0.1, training=False)
    out_eval = jax.block_until_ready(out_eval)
    ref = x + pe_table[:seq_len][:, None, :]
    assert jnp.allclose(out_eval, ref, atol=1e-6), "eval-mode mismatch vs reference"

    # Train mode: every element is either exactly 0 (dropped) or ref/(1-p) (kept).
    p = 0.1
    out_train = positional_encoding_forward(x, pe_table, p=p, training=True, seed=1234)
    out_train = jax.block_until_ready(out_train)
    assert out_train.shape == (seq_len, batch, d_model)
    expected_kept = ref / (1.0 - p)
    kept_mask = out_train != 0
    assert jnp.allclose(
        jnp.where(kept_mask, out_train, expected_kept), expected_kept, atol=1e-5
    ), "train-mode dropout scaling mismatch"

    print("KERNEL_OK")
</pallas_src>

<mosaic_0001>
module attributes {stable_mosaic.version = 11 : i64} {
  func.func @_pe_kernel(%arg0: i32, %arg1: memref<1xi32, #tpu.memory_space<smem>>, %arg2: memref<8x64xf32, #tpu.memory_space<vmem>>, %arg3: memref<8x32xf32, #tpu.memory_space<vmem>>, %arg4: memref<8x64xf32, #tpu.memory_space<vmem>>) attributes {dimension_semantics = [#tpu.dimension_semantics<parallel>], iteration_bounds = array<i64: 1>, scalar_prefetch = 1 : i64, scratch_operands = 0 : i64, tpu.core_type = #tpu.core_type<tc>, window_params = [{transform_indices = @transform_0, window_bounds = array<i64: 8, 64>}, {transform_indices = @transform_1, window_bounds = array<i64: 8, 32>}, {transform_indices = @transform_2, window_bounds = array<i64: 8, 64>}]} {
    %c0 = arith.constant 0 : index
    %c0_0 = arith.constant 0 : index
    %0 = vector.load %arg3[%c0, %c0_0] : memref<8x32xf32, #tpu.memory_space<vmem>>, vector<8x32xf32>
    %1 = tpu.concatenate %0, %0 in 1 : vector<8x32xf32>, vector<8x32xf32> -> vector<8x64xf32>
    %c0_1 = arith.constant 0 : index
    %c0_2 = arith.constant 0 : index
    %2 = vector.load %arg2[%c0_1, %c0_2] : memref<8x64xf32, #tpu.memory_space<vmem>>, vector<8x64xf32>
    %3 = arith.addf %2, %1 : vector<8x64xf32>
    %c0_3 = arith.constant 0 : index
    %c0_4 = arith.constant 0 : index
    %4 = vector.load %arg4[%c0_3, %c0_4] : memref<8x64xf32, #tpu.memory_space<vmem>>, vector<8x64xf32>
    tpu.vector_store %arg4[%c0_3, %c0_4], %3 {strides = array<i32>} : memref<8x64xf32, #tpu.memory_space<vmem>>, vector<8x64xf32>,
    return
  }
  func.func @transform_0(%arg0: i32, %arg1: memref<1xi32, #tpu.memory_space<smem>>) -> (i32, i32) {
    %c0_i32 = arith.constant 0 : i32
    %c0_i32_0 = arith.constant 0 : i32
    return %arg0, %c0_i32 : i32, i32
  }
  func.func @transform_1(%arg0: i32, %arg1: memref<1xi32, #tpu.memory_space<smem>>) -> (i32, i32) {
    %c0_i32 = arith.constant 0 : i32
    %c0_i32_0 = arith.constant 0 : i32
    return %arg0, %c0_i32 : i32, i32
  }
  func.func @transform_2(%arg0: i32, %arg1: memref<1xi32, #tpu.memory_space<smem>>) -> (i32, i32) {
    %c0_i32 = arith.constant 0 : i32
    %c0_i32_0 = arith.constant 0 : i32
    return %arg0, %c0_i32 : i32, i32
  }
}

</mosaic_0001>

<bundles_post_ra>
// kernel: tpu_custom_call.1
= control target key start
LH: loop header
LB: loop body
LE: loop exit
PB: predicated region body
PF: predicated region fallthrough
CT: control target
= control target key end

     0   :  { %9 = vsyncpa [#allocation5], 0  ;;  %s201_s0 = inlined_call_operand.<no memory space> [shape: s32[1], index: 0, kind: input, shape index: {}]   ;;  %s202_s1 = inlined_call_operand.hbm [shape: f32[8,64], index: 1, kind: input, shape index: {}]   ;;  %s203_s2 = inlined_call_operand.hbm [shape: f32[8,32], index: 2, kind: input, shape index: {}]   ;;  %s204_s3 = inlined_call_operand.hbm [shape: f32[8,64], index: 3, kind: output, shape index: {}]  }
   0x1   :  { %10 = vsyncpa [#allocation8], 0 }
   0x2   :  { %11 = vsyncpa [#allocation6], 0  ;;  %s141_s12 = smov [#allocation4]   ;;  %s142_s14 = smov [#allocation7]  }
   0x3   :  { %s18_s13 = sshll.u32 %s141_s12, 4  ;;  %s28_s15 = sshll.u32 %s142_s14, 4  ;;  %s19_s13 = int_to_ptr.vmem [resolvable:$true] %s18_s13  ;;  %s29_s15 = int_to_ptr.vmem [resolvable:$true] %s28_s15 }
   0x4   :  { %s69_s17 = scalar_lea.hbm %s202_s1, 128 }
   0x5   :  { %p70_p0 = scmp.ne.s32.totalorder %s202_s1, %s69_s17  ;;  %p73_p1 = scmp.lt.u32.totalorder %s69_s17, %s202_s1 }
   0x7   :  { %p75_p2 = pnand %p73_p1, %p70_p0 }
   0x9   :  { %78 = shalt.err (!%p75_p2)
}
   0xa   :  { %s79_s22 = scalar_lea.vmem %s19_s13, 128  ;;  %p84_p4 = scmp.lt.s32.totalorder %s19_s13, %s19_s13 }
   0xb   :  { %p80_p3 = scmp.ne.s32.totalorder %s19_s13, %s79_s22  ;;  %p85_p5 = scmp.lt.s32.totalorder %s79_s22, %s79_s22 }
   0xd   :  { %p86_p6 = por %p85_p5, %p84_p4 }
   0xf   :  { %p87_p7 = pnand %p86_p6, %p80_p3 }
  0x11   :  { %90 = shalt.err (!%p87_p7)
}
  0x12   :  { %21 = dma.hbm_to_vmem [thread:$0]  %s202_s1, 128, %s19_s13, [#allocation5]  }
  0x13   :  { %s91_s27 = scalar_lea.hbm %s203_s2, 128 }
  0x14   :  { %p92_p8 = scmp.ne.s32.totalorder %s203_s2, %s91_s27  ;;  %p95_p9 = scmp.lt.u32.totalorder %s91_s27, %s203_s2 }
  0x16   :  { %p97_p10 = pnand %p95_p9, %p92_p8 }
  0x18   :  { %100 = shalt.err (!%p97_p10)
}
  0x19   :  { %s101_s5 = scalar_lea.vmem %s29_s15, 128  ;;  %p106_p12 = scmp.lt.s32.totalorder %s29_s15, %s29_s15 }
  0x1a   :  { %p102_p11 = scmp.ne.s32.totalorder %s29_s15, %s101_s5  ;;  %p107_p13 = scmp.lt.s32.totalorder %s101_s5, %s101_s5 }
  0x1c   :  { %p108_p0 = por %p107_p13, %p106_p12 }
  0x1e   :  { %p109_p1 = pnand %p108_p0, %p102_p11 }
  0x20   :  { %112 = shalt.err (!%p109_p1)
}
  0x21   :  { %31 = dma.hbm_to_vmem [thread:$0]  %s203_s2, 128, %s29_s15, [#allocation8]  }
  0x22   :  { %135 = dma.done.wait [#allocation5], 128  }
  0x23   :  { %136 = vsyncadd [#allocation5], 4294967168 }
  0x24   :  { %137 = dma.done.wait [#allocation8], 128  }
  0x25   :  { %138 = vsyncadd [#allocation8], 4294967168  ;;  %v38_v0 = vld [vmem:[#allocation7] sm:$0xff]  ;;  %s143_s7 = smov 32   ;;  %vm43_vm0 = vcmask 261120   ;;  %v45_v1 = vld [vmem:[#allocation4] sm:$0xff] }
  0x26   :  { %40 = vrot.lane.b32.xlu0 %v38_v0, %s143_s7  ;;  %s144_s8 = smov [#allocation9]   ;;  %vm47_vm1 = vcmask 523264  }
  0x27   :  { %s55_s9 = sshll.u32 %s144_s8, 4  ;;  %s56_s9 = int_to_ptr.vmem [resolvable:$true] %s55_s9 }
  0x28   :  { %s113_s10 = scalar_lea.vmem %s56_s9, 128  ;;  %p118_p3 = scmp.lt.s32.totalorder %s56_s9, %s56_s9 }
  0x29   :  { %p114_p2 = scmp.ne.s32.totalorder %s56_s9, %s113_s10  ;;  %p119_p4 = scmp.lt.s32.totalorder %s113_s10, %s113_s10 }
  0x2b   :  { %p120_p5 = por %p119_p4, %p118_p3 }
  0x2d   :  { %p121_p6 = pnand %p120_p5, %p114_p2 }
  0x98   :  { %v41_v2 = vpop.permute.xlu0 %40 }
  0x99   :  { %v44_v3 = vsel %vm43_vm0, %v38_v0, %v41_v2 }
  0x9a   :  { %v46_v4 = vadd.f32 %v45_v1, %v44_v3 }
  0x9c   :  { %48 = vst.msk [vmem:[#allocation9] sm:$0xff] %vm47_vm1, %v46_v4 }
  0x9d   :  { %124 = shalt.err (!%p121_p6)
}
  0x9e   :  { %s125_s12 = scalar_lea.hbm %s204_s3, 128 }
  0x9f   :  { %p126_p7 = scmp.ne.s32.totalorder %s204_s3, %s125_s12  ;;  %p129_p8 = scmp.lt.u32.totalorder %s125_s12, %s204_s3 }
  0xa1   :  { %p131_p9 = pnand %p129_p8, %p126_p7 }
  0xa3   :  { %134 = shalt.err (!%p131_p9)
}
  0xa4   :  { %58 = dma.vmem_to_hbm [thread:$0]  %s56_s9, 128, %s204_s3, [#allocation6]  }
  0xa5   :  { %139 = dma.done.wait [#allocation6], 128  }
  0xa6   :  { %140 = vsyncadd [#allocation6], 4294967168 }
  0xa7   :  { %62 = vsyncpa [#allocation5], 1 }
  0xa8   :  { %63 = vsyncpa [#allocation8], 1 }
  0xa9   :  { %64 = vsyncpa [#allocation6], 1 }

</bundles_post_ra>
